<compile_context>
chip_gen: v6e
topology: v6e:2x2x1
jax: 0.10.0
libtpu: 0.0.40
codegen_flags: <defaults>
</compile_context>

<pallas_src>
import jax
import jax.numpy as jnp
from jax.experimental import pallas as pl
from jax.experimental.pallas import tpu as pltpu


# ---------------------------------------------------------------------------
# Kernel
# ---------------------------------------------------------------------------
def fused_deeponet_kernel(u_ref, y_ref, w1u_ref, w1y_ref, w234_ref, w5_ref,
                          b14_ref, b5_ref, out_ref):
    mm_dtype = w234_ref.dtype  # bf16 matmul inputs, f32 accumulation

    # ---- layer 1 (fused branch||trunk, block-diagonal columns) ----
    # branch half: one MXU matmul (tile_b, S) @ (S, 2H); trunk columns are zero
    h = jnp.dot(u_ref[...], w1u_ref[...], preferred_element_type=jnp.float32)
    # trunk half: K=2 contraction as two f32 VPU broadcast FMAs (no MXU stage)
    h = h + y_ref[:, 0:1] * w1y_ref[0:1, :] + y_ref[:, 1:2] * w1y_ref[1:2, :]
    h = jnp.tanh(h + b14_ref[0:1, :])

    # ---- layers 2-4: block-diagonal (2H, 2H) matmuls + tanh (unrolled) ----
    for l in range(3):
        h = jnp.tanh(
            jnp.dot(h.astype(mm_dtype), w234_ref[l],
                    preferred_element_type=jnp.float32)
            + b14_ref[l + 1:l + 2, :])

    # ---- layer 5 (no activation), stacked halves to avoid lane-offset slice ----
    hb = h.astype(mm_dtype)
    zb = jnp.dot(hb, w5_ref[0], preferred_element_type=jnp.float32) + b5_ref[0]
    zt = jnp.dot(hb, w5_ref[1], preferred_element_type=jnp.float32) + b5_ref[1]

    # ---- einsum('ij,ij->i', branch, trunk); lane-dense (1, tile_b) row store ----
    out_ref[...] = jnp.sum(zb * zt, axis=1)[None, :]


# ---------------------------------------------------------------------------
# Wrapper
# ---------------------------------------------------------------------------
def _round_up(x, m):
    return -(-x // m) * m


def deeponet_forward(u, y, packed, *, batch_tile=256):
    """u: (batch, n_sensors), y: (batch, 2) -> (batch,)"""
    w1u, w1y, w234, w5, b14, b5 = packed
    batch, n_sensors = u.shape

    # --- choose a lane-dense batch tile (multiple of 128) ---
    bt = max(128, _round_up(batch_tile, 128))
    rows = _round_up(batch, 128)
    bt = min(bt, rows)                              # clamp for small batches
    if rows >= 2 * 128:                             # >=2 tiles -> both v7x TCs busy
        bt = min(bt, _round_up(-(-rows // 2), 128))
    padded = _round_up(batch, bt)
    num_tiles = padded // bt

    # bf16 MXU inputs for u; y stays f32 (VPU path)
    u = u.astype(w1u.dtype)
    y = y.astype(jnp.float32)
    if padded != batch:
        u = jnp.pad(u, ((0, padded - batch), (0, 0)))
        y = jnp.pad(y, ((0, padded - batch), (0, 0)))

    grid_spec = pltpu.PrefetchScalarGridSpec(
        num_scalar_prefetch=0,
        grid=(num_tiles,),
        in_specs=[
            # batch-tiled activations (pipelined against compute)
            pl.BlockSpec((bt, n_sensors), lambda i: (i, 0)),
            pl.BlockSpec((bt, 2), lambda i: (i, 0)),
            # weights / biases: constant index_map -> VMEM-resident across grid
            pl.BlockSpec(w1u.shape, lambda i: (0, 0)),
            pl.BlockSpec(w1y.shape, lambda i: (0, 0)),
            pl.BlockSpec(w234.shape, lambda i: (0, 0, 0)),
            pl.BlockSpec(w5.shape, lambda i: (0, 0, 0)),
            pl.BlockSpec(b14.shape, lambda i: (0, 0)),
            pl.BlockSpec(b5.shape, lambda i: (0, 0, 0)),
        ],
        out_specs=pl.BlockSpec((1, bt), lambda i: (i, 0)),
    )

    two_h = w234.shape[-1]
    p_out = w5.shape[-1]
    flops = 2 * padded * (n_sensors * two_h + 3 * two_h * two_h + 2 * two_h * p_out)
    weight_bytes = sum(int(a.size) * a.dtype.itemsize for a in packed)
    cost = pl.CostEstimate(
        flops=int(flops),
        transcendentals=int(4 * two_h * padded),
        bytes_accessed=int(u.size * u.dtype.itemsize + y.size * 4
                           + weight_bytes + padded * 4),
    )

    out = pl.pallas_call(
        fused_deeponet_kernel,
        out_shape=jax.ShapeDtypeStruct((num_tiles, bt), jnp.float32),
        grid_spec=grid_spec,
        compiler_params=pltpu.CompilerParams(
            dimension_semantics=("parallel",)),
        cost_estimate=cost,
    )(u, y, w1u, w1y, w234, w5, b14, b5)

    return out.reshape(padded)[:batch]


# ---------------------------------------------------------------------------
# Parameter construction (PyTorch-style init) and block-diagonal packing
# ---------------------------------------------------------------------------
def init_linear(key, in_features, out_features):
    """torch.nn.Linear init: U(-1/sqrt(in), 1/sqrt(in)); W pre-transposed."""
    kw, kb = jax.random.split(key)
    bound = 1.0 / jnp.sqrt(jnp.float32(in_features))
    w = jax.random.uniform(kw, (in_features, out_features), jnp.float32,
                           minval=-bound, maxval=bound)
    b = jax.random.uniform(kb, (1, out_features), jnp.float32,
                           minval=-bound, maxval=bound)
    return w, b


def make_params(key, n_sensors, n_hidden, n_output):
    keys = jax.random.split(key, 10)
    dims = ([(n_sensors, n_hidden)] + [(n_hidden, n_hidden)] * 3
            + [(n_hidden, n_output)]
            + [(2, n_hidden)] + [(n_hidden, n_hidden)] * 3
            + [(n_hidden, n_output)])
    params = []
    for i, (fi, fo) in enumerate(dims):
        params.extend(init_linear(keys[i], fi, fo))
    return params  # wb1,bb1,...,wb5,bb5, wt1,bt1,...,wt5,bt5


def _block_diag(a, b):
    (ra, ca), (rb, cb) = a.shape, b.shape
    top = jnp.concatenate([a, jnp.zeros((ra, cb), a.dtype)], axis=1)
    bot = jnp.concatenate([jnp.zeros((rb, ca), b.dtype), b], axis=1)
    return jnp.concatenate([top, bot], axis=0)


def pack_params(params, matmul_dtype=jnp.bfloat16):
    """Fuse branch+trunk into block-diagonal buffers (once, host-side).

    MXU operands (w1u, w234, w5) are stored in `matmul_dtype`; everything on the
    VPU/EUP path (w1y for the K=2 trunk FMA, all biases) stays f32.
    """
    (wb1, bb1, wb2, bb2, wb3, bb3, wb4, bb4, wb5, bb5,
     wt1, bt1, wt2, bt2, wt3, bt3, wt4, bt4, wt5, bt5) = params
    n_sensors, h = wb1.shape
    p = wb5.shape[1]

    w1u = jnp.concatenate([wb1, jnp.zeros((n_sensors, h), wb1.dtype)],
                          axis=1).astype(matmul_dtype)                        # (S, 2H)
    w1y = jnp.concatenate([jnp.zeros((2, h), wt1.dtype), wt1], axis=1)        # (2, 2H) f32
    w234 = jnp.stack([_block_diag(wb2, wt2),
                      _block_diag(wb3, wt3),
                      _block_diag(wb4, wt4)], axis=0).astype(matmul_dtype)    # (3, 2H, 2H)
    w5 = jnp.stack([jnp.concatenate([wb5, jnp.zeros((h, p), wb5.dtype)], axis=0),
                    jnp.concatenate([jnp.zeros((h, p), wt5.dtype), wt5], axis=0)],
                   axis=0).astype(matmul_dtype)                               # (2, 2H, P)
    b14 = jnp.concatenate([jnp.concatenate([bb1, bt1], axis=1),
                           jnp.concatenate([bb2, bt2], axis=1),
                           jnp.concatenate([bb3, bt3], axis=1),
                           jnp.concatenate([bb4, bt4], axis=1)], axis=0)      # (4, 2H) f32
    b5 = jnp.stack([bb5, bt5], axis=0)                                        # (2, 1, P) f32
    return w1u, w1y, w234, w5, b14, b5


# ---------------------------------------------------------------------------
# Pure-JAX reference (mirrors the PyTorch module; matmul_dtype mirrors the
# kernel's bf16 MXU-input quantization when set to bfloat16)
# ---------------------------------------------------------------------------
def reference_forward(u, y, params, matmul_dtype=jnp.float32):
    (wb1, bb1, wb2, bb2, wb3, bb3, wb4, bb4, wb5, bb5,
     wt1, bt1, wt2, bt2, wt3, bt3, wt4, bt4, wt5, bt5) = params

    def mm(x, w):
        return jnp.dot(x.astype(matmul_dtype), w.astype(matmul_dtype),
                       preferred_element_type=jnp.float32)

    b = jnp.tanh(mm(u, wb1) + bb1)
    b = jnp.tanh(mm(b, wb2) + bb2)
    b = jnp.tanh(mm(b, wb3) + bb3)
    b = jnp.tanh(mm(b, wb4) + bb4)
    b = mm(b, wb5) + bb5
    t = jnp.tanh(y @ wt1 + bt1)          # K=2 trunk layer stays f32 (VPU path in kernel)
    t = jnp.tanh(mm(t, wt2) + bt2)
    t = jnp.tanh(mm(t, wt3) + bt3)
    t = jnp.tanh(mm(t, wt4) + bt4)
    t = mm(t, wt5) + bt5
    return jnp.einsum('ij,ij->i', b, t)


if __name__ == "__main__":
    n_sensors, n_hidden, n_output = 16, 32, 8
    batch = 16

    key = jax.random.PRNGKey(0)
    k_u, k_y, k_p = jax.random.split(key, 3)

    u = jax.random.normal(k_u, (batch, n_sensors), jnp.float32)
    y = jax.random.normal(k_y, (batch, 2), jnp.float32)

    params = make_params(k_p, n_sensors, n_hidden, n_output)
    packed = pack_params(params, matmul_dtype=jnp.bfloat16)

    out = deeponet_forward(u, y, packed, batch_tile=256)
    jax.block_until_ready(out)
    assert out.shape == (batch,)

    # Exact check against a reference using the same bf16-MXU-input quantization.
    ref_matched = reference_forward(u, y, params, matmul_dtype=jnp.bfloat16)
    assert jnp.allclose(out, ref_matched, atol=2e-3, rtol=2e-3), (
        f"max abs err vs matched ref = {jnp.max(jnp.abs(out - ref_matched))}")

    # Sanity check against the full-f32 PyTorch-equivalent reference
    # (loose tolerance only covers bf16 quantization of the MXU inputs).
    ref_exact = reference_forward(u, y, params)
    assert jnp.allclose(out, ref_exact, atol=1e-1, rtol=1e-1), (
        f"max abs err vs exact ref = {jnp.max(jnp.abs(out - ref_exact))}")

    print("KERNEL_OK")
</pallas_src>

<mosaic_0001>
module attributes {stable_mosaic.version = 11 : i64} {
  func.func @fused_deeponet_kernel(%arg0: i32, %arg1: memref<128x16xbf16, #tpu.memory_space<vmem>>, %arg2: memref<128x2xf32, #tpu.memory_space<vmem>>, %arg3: memref<16x64xbf16, #tpu.memory_space<vmem>>, %arg4: memref<2x64xf32, #tpu.memory_space<vmem>>, %arg5: memref<3x64x64xbf16, #tpu.memory_space<vmem>>, %arg6: memref<2x64x8xbf16, #tpu.memory_space<vmem>>, %arg7: memref<4x64xf32, #tpu.memory_space<vmem>>, %arg8: memref<2x1x8xf32, #tpu.memory_space<vmem>>, %arg9: memref<1x128xf32, #tpu.memory_space<vmem>>) attributes {dimension_semantics = [#tpu.dimension_semantics<parallel>], iteration_bounds = array<i64: 1>, scalar_prefetch = 0 : i64, scratch_operands = 0 : i64, tpu.core_type = #tpu.core_type<tc>, window_params = [{transform_indices = @transform_0, window_bounds = array<i64: 128, 16>}, {transform_indices = @transform_1, window_bounds = array<i64: 128, 2>}, {pipeline_mode = #tpu.pipeline_mode<synchronous>, transform_indices = @transform_2, window_bounds = array<i64: 16, 64>}, {pipeline_mode = #tpu.pipeline_mode<synchronous>, transform_indices = @transform_3, window_bounds = array<i64: 2, 64>}, {pipeline_mode = #tpu.pipeline_mode<synchronous>, transform_indices = @transform_4, window_bounds = array<i64: 3, 64, 64>}, {pipeline_mode = #tpu.pipeline_mode<synchronous>, transform_indices = @transform_5, window_bounds = array<i64: 2, 64, 8>}, {pipeline_mode = #tpu.pipeline_mode<synchronous>, transform_indices = @transform_6, window_bounds = array<i64: 4, 64>}, {pipeline_mode = #tpu.pipeline_mode<synchronous>, transform_indices = @transform_7, window_bounds = array<i64: 2, 1, 8>}, {transform_indices = @transform_8, window_bounds = array<i64: 1, 128>}]} {
    %c0 = arith.constant 0 : index
    %c0_0 = arith.constant 0 : index
    %0 = vector.load %arg1[%c0, %c0_0] : memref<128x16xbf16, #tpu.memory_space<vmem>>, vector<128x16xbf16>
    %c0_1 = arith.constant 0 : index
    %c0_2 = arith.constant 0 : index
    %1 = vector.load %arg3[%c0_1, %c0_2] : memref<16x64xbf16, #tpu.memory_space<vmem>>, vector<16x64xbf16>
    %cst = arith.constant dense<0.000000e+00> : vector<128x64xf32>
    %2 = tpu.matmul %0, %1, %cst {dimension_numbers = #tpu.dot_dimension_numbers<[1], [0], [0], [1], [0, 0, 1, 1], [], []>} : vector<128x16xbf16>, vector<16x64xbf16>, vector<128x64xf32> -> vector<128x64xf32>
    %c0_3 = arith.constant 0 : index
    %c0_4 = arith.constant 0 : index
    %3 = vector.load %arg2[%c0_3, %c0_4] : memref<128x2xf32, #tpu.memory_space<vmem>>, vector<128x1xf32>
    %c0_5 = arith.constant 0 : index
    %c0_6 = arith.constant 0 : index
    %4 = vector.load %arg4[%c0_5, %c0_6] : memref<2x64xf32, #tpu.memory_space<vmem>>, vector<1x64xf32>
    %5 = vector.broadcast %3 : vector<128x1xf32> to vector<128x64xf32>
    %6 = vector.broadcast %4 : vector<1x64xf32> to vector<128x64xf32>
    %7 = arith.mulf %5, %6 : vector<128x64xf32>
    %8 = arith.addf %2, %7 : vector<128x64xf32>
    %c0_7 = arith.constant 0 : index
    %c1 = arith.constant 1 : index
    %9 = vector.load %arg2[%c0_7, %c1] : memref<128x2xf32, #tpu.memory_space<vmem>>, vector<128x1xf32>
    %c1_8 = arith.constant 1 : index
    %c0_9 = arith.constant 0 : index
    %10 = vector.load %arg4[%c1_8, %c0_9] : memref<2x64xf32, #tpu.memory_space<vmem>>, vector<1x64xf32>
    %11 = vector.broadcast %9 : vector<128x1xf32> to vector<128x64xf32>
    %12 = vector.broadcast %10 : vector<1x64xf32> to vector<128x64xf32>
    %13 = arith.mulf %11, %12 : vector<128x64xf32>
    %14 = arith.addf %8, %13 : vector<128x64xf32>
    %c0_10 = arith.constant 0 : index
    %c0_11 = arith.constant 0 : index
    %15 = vector.load %arg7[%c0_10, %c0_11] : memref<4x64xf32, #tpu.memory_space<vmem>>, vector<1x64xf32>
    %16 = vector.broadcast %15 : vector<1x64xf32> to vector<128x64xf32>
    %17 = arith.addf %14, %16 : vector<128x64xf32>
    %18 = math.tanh %17 : vector<128x64xf32>
    %19 = arith.truncf %18 : vector<128x64xf32> to vector<128x64xbf16>
    %c0_12 = arith.constant 0 : index
    %c0_13 = arith.constant 0 : index
    %c0_14 = arith.constant 0 : index
    %20 = vector.load %arg5[%c0_12, %c0_13, %c0_14] : memref<3x64x64xbf16, #tpu.memory_space<vmem>>, vector<1x64x64xbf16>
    %21 = vector.shape_cast %20 : vector<1x64x64xbf16> to vector<64x64xbf16>
    %cst_15 = arith.constant dense<0.000000e+00> : vector<128x64xf32>
    %22 = tpu.matmul %19, %21, %cst_15 {dimension_numbers = #tpu.dot_dimension_numbers<[1], [0], [0], [1], [0, 0, 1, 1], [], []>} : vector<128x64xbf16>, vector<64x64xbf16>, vector<128x64xf32> -> vector<128x64xf32>
    %c1_16 = arith.constant 1 : index
    %c0_17 = arith.constant 0 : index
    %23 = vector.load %arg7[%c1_16, %c0_17] : memref<4x64xf32, #tpu.memory_space<vmem>>, vector<1x64xf32>
    %24 = vector.broadcast %23 : vector<1x64xf32> to vector<128x64xf32>
    %25 = arith.addf %22, %24 : vector<128x64xf32>
    %26 = math.tanh %25 : vector<128x64xf32>
    %27 = arith.truncf %26 : vector<128x64xf32> to vector<128x64xbf16>
    %c1_18 = arith.constant 1 : index
    %c0_19 = arith.constant 0 : index
    %c0_20 = arith.constant 0 : index
    %28 = vector.load %arg5[%c1_18, %c0_19, %c0_20] : memref<3x64x64xbf16, #tpu.memory_space<vmem>>, vector<1x64x64xbf16>
    %29 = vector.shape_cast %28 : vector<1x64x64xbf16> to vector<64x64xbf16>
    %cst_21 = arith.constant dense<0.000000e+00> : vector<128x64xf32>
    %30 = tpu.matmul %27, %29, %cst_21 {dimension_numbers = #tpu.dot_dimension_numbers<[1], [0], [0], [1], [0, 0, 1, 1], [], []>} : vector<128x64xbf16>, vector<64x64xbf16>, vector<128x64xf32> -> vector<128x64xf32>
    %c2 = arith.constant 2 : index
    %c0_22 = arith.constant 0 : index
    %31 = vector.load %arg7[%c2, %c0_22] : memref<4x64xf32, #tpu.memory_space<vmem>>, vector<1x64xf32>
    %32 = vector.broadcast %31 : vector<1x64xf32> to vector<128x64xf32>
    %33 = arith.addf %30, %32 : vector<128x64xf32>
    %34 = math.tanh %33 : vector<128x64xf32>
    %35 = arith.truncf %34 : vector<128x64xf32> to vector<128x64xbf16>
    %c2_23 = arith.constant 2 : index
    %c0_24 = arith.constant 0 : index
    %c0_25 = arith.constant 0 : index
    %36 = vector.load %arg5[%c2_23, %c0_24, %c0_25] : memref<3x64x64xbf16, #tpu.memory_space<vmem>>, vector<1x64x64xbf16>
    %37 = vector.shape_cast %36 : vector<1x64x64xbf16> to vector<64x64xbf16>
    %cst_26 = arith.constant dense<0.000000e+00> : vector<128x64xf32>
    %38 = tpu.matmul %35, %37, %cst_26 {dimension_numbers = #tpu.dot_dimension_numbers<[1], [0], [0], [1], [0, 0, 1, 1], [], []>} : vector<128x64xbf16>, vector<64x64xbf16>, vector<128x64xf32> -> vector<128x64xf32>
    %c3 = arith.constant 3 : index
    %c0_27 = arith.constant 0 : index
    %39 = vector.load %arg7[%c3, %c0_27] : memref<4x64xf32, #tpu.memory_space<vmem>>, vector<1x64xf32>
    %40 = vector.broadcast %39 : vector<1x64xf32> to vector<128x64xf32>
    %41 = arith.addf %38, %40 : vector<128x64xf32>
    %42 = math.tanh %41 : vector<128x64xf32>
    %43 = arith.truncf %42 : vector<128x64xf32> to vector<128x64xbf16>
    %c0_28 = arith.constant 0 : index
    %c0_29 = arith.constant 0 : index
    %c0_30 = arith.constant 0 : index
    %44 = vector.load %arg6[%c0_28, %c0_29, %c0_30] : memref<2x64x8xbf16, #tpu.memory_space<vmem>>, vector<1x64x8xbf16>
    %45 = vector.shape_cast %44 : vector<1x64x8xbf16> to vector<64x8xbf16>
    %cst_31 = arith.constant dense<0.000000e+00> : vector<128x8xf32>
    %46 = tpu.matmul %43, %45, %cst_31 {dimension_numbers = #tpu.dot_dimension_numbers<[1], [0], [0], [1], [0, 0, 1, 1], [], []>} : vector<128x64xbf16>, vector<64x8xbf16>, vector<128x8xf32> -> vector<128x8xf32>
    %c0_32 = arith.constant 0 : index
    %c0_33 = arith.constant 0 : index
    %c0_34 = arith.constant 0 : index
    %47 = vector.load %arg8[%c0_32, %c0_33, %c0_34] : memref<2x1x8xf32, #tpu.memory_space<vmem>>, vector<1x1x8xf32>
    %48 = vector.shape_cast %47 : vector<1x1x8xf32> to vector<1x8xf32>
    %49 = vector.broadcast %48 : vector<1x8xf32> to vector<128x8xf32>
    %50 = arith.addf %46, %49 : vector<128x8xf32>
    %c1_35 = arith.constant 1 : index
    %c0_36 = arith.constant 0 : index
    %c0_37 = arith.constant 0 : index
    %51 = vector.load %arg6[%c1_35, %c0_36, %c0_37] : memref<2x64x8xbf16, #tpu.memory_space<vmem>>, vector<1x64x8xbf16>
    %52 = vector.shape_cast %51 : vector<1x64x8xbf16> to vector<64x8xbf16>
    %cst_38 = arith.constant dense<0.000000e+00> : vector<128x8xf32>
    %53 = tpu.matmul %43, %52, %cst_38 {dimension_numbers = #tpu.dot_dimension_numbers<[1], [0], [0], [1], [0, 0, 1, 1], [], []>} : vector<128x64xbf16>, vector<64x8xbf16>, vector<128x8xf32> -> vector<128x8xf32>
    %c1_39 = arith.constant 1 : index
    %c0_40 = arith.constant 0 : index
    %c0_41 = arith.constant 0 : index
    %54 = vector.load %arg8[%c1_39, %c0_40, %c0_41] : memref<2x1x8xf32, #tpu.memory_space<vmem>>, vector<1x1x8xf32>
    %55 = vector.shape_cast %54 : vector<1x1x8xf32> to vector<1x8xf32>
    %56 = vector.broadcast %55 : vector<1x8xf32> to vector<128x8xf32>
    %57 = arith.addf %53, %56 : vector<128x8xf32>
    %58 = arith.mulf %50, %57 : vector<128x8xf32>
    %cst_42 = arith.constant dense<0.000000e+00> : vector<128xf32>
    %59 = vector.multi_reduction <add>, %58, %cst_42 [1] : vector<128x8xf32> to vector<128xf32>
    %60 = vector.shape_cast %59 : vector<128xf32> to vector<1x128xf32>
    %c0_43 = arith.constant 0 : index
    %c0_44 = arith.constant 0 : index
    %61 = vector.load %arg9[%c0_43, %c0_44] : memref<1x128xf32, #tpu.memory_space<vmem>>, vector<1x128xf32>
    tpu.vector_store %arg9[%c0_43, %c0_44], %60 {strides = array<i32>} : memref<1x128xf32, #tpu.memory_space<vmem>>, vector<1x128xf32>,
    return
  }
  func.func @transform_0(%arg0: i32) -> (i32, i32) {
    %c0_i32 = arith.constant 0 : i32
    %c0_i32_0 = arith.constant 0 : i32
    return %arg0, %c0_i32 : i32, i32
  }
  func.func @transform_1(%arg0: i32) -> (i32, i32) {
    %c0_i32 = arith.constant 0 : i32
    %c0_i32_0 = arith.constant 0 : i32
    return %arg0, %c0_i32 : i32, i32
  }
  func.func @transform_2(%arg0: i32) -> (i32, i32) {
    %c0_i32 = arith.constant 0 : i32
    %c0_i32_0 = arith.constant 0 : i32
    %c0_i32_1 = arith.constant 0 : i32
    return %c0_i32, %c0_i32_0 : i32, i32
  }
  func.func @transform_3(%arg0: i32) -> (i32, i32) {
    %c0_i32 = arith.constant 0 : i32
    %c0_i32_0 = arith.constant 0 : i32
    %c0_i32_1 = arith.constant 0 : i32
    return %c0_i32, %c0_i32_0 : i32, i32
  }
  func.func @transform_4(%arg0: i32) -> (i32, i32, i32) {
    %c0_i32 = arith.constant 0 : i32
    %c0_i32_0 = arith.constant 0 : i32
    %c0_i32_1 = arith.constant 0 : i32
    %c0_i32_2 = arith.constant 0 : i32
    return %c0_i32, %c0_i32_0, %c0_i32_1 : i32, i32, i32
  }
  func.func @transform_5(%arg0: i32) -> (i32, i32, i32) {
    %c0_i32 = arith.constant 0 : i32
    %c0_i32_0 = arith.constant 0 : i32
    %c0_i32_1 = arith.constant 0 : i32
    %c0_i32_2 = arith.constant 0 : i32
    return %c0_i32, %c0_i32_0, %c0_i32_1 : i32, i32, i32
  }
  func.func @transform_6(%arg0: i32) -> (i32, i32) {
    %c0_i32 = arith.constant 0 : i32
    %c0_i32_0 = arith.constant 0 : i32
    %c0_i32_1 = arith.constant 0 : i32
    return %c0_i32, %c0_i32_0 : i32, i32
  }
  func.func @transform_7(%arg0: i32) -> (i32, i32, i32) {
    %c0_i32 = arith.constant 0 : i32
    %c0_i32_0 = arith.constant 0 : i32
    %c0_i32_1 = arith.constant 0 : i32
    %c0_i32_2 = arith.constant 0 : i32
    return %c0_i32, %c0_i32_0, %c0_i32_1 : i32, i32, i32
  }
  func.func @transform_8(%arg0: i32) -> (i32, i32) {
    %c0_i32 = arith.constant 0 : i32
    %c0_i32_0 = arith.constant 0 : i32
    return %arg0, %c0_i32 : i32, i32
  }
}

</mosaic_0001>

<bundles_post_ra>
// kernel: tpu_custom_call.1
= control target key start
LH: loop header
LB: loop body
LE: loop exit
PB: predicated region body
PF: predicated region fallthrough
CT: control target
= control target key end

     0   :  { %vm212_vm0 = vcmask 130048   ;;  %v2044_v3 = vmov 0   ;;  %v2045_v11 = vmov 1   ;;  %s2479_s0 = inlined_call_operand.vmem [shape: bf16[128,16], index: 0, kind: input, shape index: {}]   ;;  %s2480_s1 = inlined_call_operand.vmem [shape: f32[128,2], index: 1, kind: input, shape index: {}]   ;;  %s2481_s2 = inlined_call_operand.vmem [shape: bf16[16,64], index: 2, kind: input, shape index: {}]   ;;  %s2482_s3 = inlined_call_operand.vmem [shape: f32[2,64], index: 3, kind: input, shape index: {}]   ;;  %s2483_s4 = inlined_call_operand.vmem [shape: bf16[3,64,64], index: 4, kind: input, shape index: {}]   ;;  %s2484_s5 = inlined_call_operand.vmem [shape: bf16[2,64,8], index: 5, kind: input, shape index: {}]   ;;  %s2485_s6 = inlined_call_operand.vmem [shape: f32[4,64], index: 6, kind: input, shape index: {}]   ;;  %s2486_s7 = inlined_call_operand.vmem [shape: f32[2,1,8], index: 7, kind: input, shape index: {}]   ;;  %s2487_s8 = inlined_call_operand.hbm [shape: f32[1,128], index: 8, kind: output, shape index: {}]  }
   0x1   :  { %v1865_v0 = vld [vmem:[%s2481_s2] sm:$0xff]   ;;  %v1867_v2 = vld [vmem:[%s2479_s0 + $0x8] sm:$0xff]   ;;  %1856 = vset.pattern.permute.xlu1 %v2044_v3  ;;  %v1868_v4 = vld [vmem:[%s2479_s0 + $0x10] sm:$0xff]   ;;  %1855 = vset.pattern.permute.xlu0 %v2044_v3 }
   0x2   :  { %v1866_v1 = vld [vmem:[%s2479_s0] sm:$0xff]   ;;  %1714 = vmatprep.subr.bf16.mxu0 %v1865_v0  ;;  %v51_v5 = vld [vmem:[%s2480_s1 + $0x10] sm:$0xff]  ;;  %v52_v6 = vld [vmem:[%s2480_s1 + $0x18] sm:$0xff] }
   0x3   :  { %1715 = vmatpush3.bf16.msra.mxu0 %v1865_v0  ;;  %1716 = vmatprep.mubr.msk.bf16.mxu0 %vm212_vm0, %v1866_v1  ;;  %v49_v7 = vld [vmem:[%s2480_s1] sm:$0xff]  ;;  %v1869_v8 = vld [vmem:[%s2479_s0 + $0x18] sm:$0xff]   ;;  %v50_v10 = vld [vmem:[%s2480_s1 + $0x8] sm:$0xff] }
   0x4   :  { %78 = vperm.xlu1 %1856, %v51_v5   ;;  %68 = vperm.xlu0 %1855, %v49_v7   ;;  %v1870_v9 = vld [vmem:[%s2479_s0 + $0x20] sm:$0xff]   ;;  %v54_v12 = vld [vmem:[%s2480_s1 + $0x28] sm:$0xff]  ;;  %v1872_v15 = vld [vmem:[%s2479_s0 + $0x30] sm:$0xff]  }
   0x5   :  { %v1871_v13 = vld [vmem:[%s2479_s0 + $0x28] sm:$0xff]   ;;  %v53_v16 = vld [vmem:[%s2480_s1 + $0x20] sm:$0xff]  ;;  %v55_v18 = vld [vmem:[%s2480_s1 + $0x30] sm:$0xff] }
   0x6   :  { %1717 = vmatmul.mubr.msk.bf16.vlgmr.msra.gmra.mxu0 %vm212_vm0, %v1867_v2  ;;  %v58_v14 = vld [vmem:[%s2480_s1 + $0x48] sm:$0xff]  ;;  %v1873_v19 = vld [vmem:[%s2479_s0 + $0x38] sm:$0xff]  }
   0x7   :  { %1720 = vmatprep.mubr.msk.bf16.mxu0 %vm212_vm0, %v1868_v4  ;;  %v62_v17 = vld [vmem:[%s2480_s1 + $0x68] sm:$0xff] }
   0x8   :  { %83 = vperm.xlu1 %1856, %v52_v6   ;;  %73 = vperm.xlu0 %1855, %v50_v10  }
   0xc   :  { %1857 = vset.pattern.permute.xlu1 %v2045_v11  ;;  %93 = vperm.xlu0 %1855, %v54_v12  }
   0xd   :  { %340 = vperm.xlu1 %1857, %v50_v10  }
   0xe   :  { %1721 = vmatmul.mubr.msk.bf16.gmra.mxu0 %vm212_vm0, %v1869_v8 }
   0xf   :  { %1724 = vmatprep.mubr.msk.bf16.mxu0 %vm212_vm0, %v1870_v9 }
  0x10   :  { %113 = vperm.xlu0 %1855, %v58_v14  }
  0x11   :  { %344 = vperm.xlu1 %1857, %v51_v5  }
  0x14   :  { %133 = vperm.xlu0 %1855, %v62_v17  }
  0x15   :  { %1858 = vset.pattern.permute.xlu1 %v2044_v3 }
  0x16   :  { %1725 = vmatmul.mubr.msk.bf16.gmra.mxu0 %vm212_vm0, %v1871_v13  ;;  %88 = vperm.xlu1 %1858, %v53_v16  }
  0x17   :  { %1728 = vmatprep.mubr.msk.bf16.mxu0 %vm212_vm0, %v1872_v15 }
  0x1a   :  { %98 = vperm.xlu1 %1858, %v55_v18  }
  0x1b   :  { %13 = vsyncpa [#allocation3], 0  ;;  %v56_v20 = vld [vmem:[%s2480_s1 + $0x38] sm:$0xff]  ;;  %1863 = vset.pattern.permute.xlu0 %v2045_v11  ;;  %v57_v21 = vld [vmem:[%s2480_s1 + $0x40] sm:$0xff]  ;;  %vm517_vm1 = vcmask 523264   ;;  %vm1343_vm2 = vcmask 64512  }
  0x1c   :  { %336 = vperm.xlu0 %1863, %v49_v7   ;;  %v59_v22 = vld [vmem:[%s2480_s1 + $0x50] sm:$0xff]  ;;  %v60_v23 = vld [vmem:[%s2480_s1 + $0x58] sm:$0xff]  ;;  %v61_v24 = vld [vmem:[%s2480_s1 + $0x60] sm:$0xff]  ;;  %vm1419_vm3 = vcmask 130112   ;;  %vm1426_vm4 = vcmask 195712   ;;  %vm1433_vm5 = vcmask 261312  }
  0x1d   :  { %v64_v25 = vld [vmem:[%s2480_s1 + $0x78] sm:$0xff]  ;;  %v63_v26 = vld [vmem:[%s2480_s1 + $0x70] sm:$0xff]  ;;  %v1876_v29 = vld [vmem:[%s2483_s4 + $0x8] sm:$0xff]   ;;  %vm1440_vm6 = vcmask 326912   ;;  %vm1447_vm7 = vcmask 392512   ;;  %vm1454_vm8 = vcmask 458112  }
  0x1e   :  { %1729 = vmatmul.mubr.msk.bf16.gmra.mxu0 %vm212_vm0, %v1873_v19  ;;  %103 = vperm.xlu1 %1858, %v56_v20   ;;  %v1874_v27 = vld [vmem:[%s2483_s4 + $0x18] sm:$0xff]   ;;  %v1875_v28 = vld [vmem:[%s2483_s4 + $0x10] sm:$0xff]   ;;  %v1877_v30 = vld [vmem:[%s2483_s4] sm:$0xff]   ;;  %vm1461_vm9 = vcmask 523712   ;;  %vm1468_vm10 = vcmask 589312   ;;  %vm1475_vm11 = vcmask 654912  }
  0x1f   :  { %1732 = vmatprep.subr.bf16.mxu1 %v1874_v27  ;;  %v1878_v31 = vld [vmem:[%s2483_s4 + $0x38] sm:$0xff]   ;;  %v2214_v54 = vld [vmem:[%s2482_s3] ss:$0 sm:$0xff]  ;;  %v2219_v55 = vld [vmem:[%s2482_s3 + $0x1] ss:$0 sm:$0xff]  ;;  %vm1482_vm12 = vcmask 720512  }
  0x20   :  { %348 = vperm.xlu0 %1863, %v52_v6   ;;  %1733 = vmatpush3.bf16.msra.mxu1 %v1874_v27  ;;  %v2232_v5 = vld [vmem:[%s2485_s6] ss:$0 sm:$0xff]  ;;  %vm1489_vm13 = vcmask 786112   ;;  %vm1496_vm14 = vcmask 851712   ;;  %vm1503_vm15 = vcmask 917312   ;;  %vm1510_vm0 = vcmask 982912  }
  0x21   :  { %1734 = vmatprep.subr.bf16.mxu1 %v1875_v28  ;;  %1756 = vmatprep.subr.bf16.mxu0 %v1878_v31 }
  0x22   :  { %1859 = vset.pattern.permute.xlu1 %v2045_v11  ;;  %1757 = vmatpush3.bf16.msra.mxu0 %v1878_v31 }
  0x23   :  { %356 = vperm.xlu1 %1859, %v54_v12  }
  0x24   :  { %352 = vperm.xlu0 %1863, %v53_v16   ;;  %1735 = vmatpush3.bf16.msra.mxu1 %v1875_v28 }
  0x25   :  { %1736 = vmatprep.subr.bf16.mxu1 %v1876_v29 }
  0x27   :  { %360 = vperm.xlu1 %1859, %v55_v18  }
  0x28   :  { %364 = vperm.xlu0 %1863, %v56_v20   ;;  %1737 = vmatpush3.bf16.msra.mxu1 %v1876_v29 }
  0x29   :  { %1738 = vmatprep.subr.bf16.mxu1 %v1877_v30 }
  0x2b   :  { %1860 = vset.pattern.permute.xlu1 %v2044_v3 }
  0x2c   :  { %108 = vperm.xlu1 %1860, %v57_v21   ;;  %368 = vperm.xlu0 %1863, %v57_v21  }
  0x2d   :  { %1739 = vmatpush3.bf16.msra.mxu1 %v1877_v30 }
  0x30   :  { %118 = vperm.xlu1 %1860, %v59_v22   ;;  %380 = vperm.xlu0 %1863, %v60_v23  }
  0x34   :  { %123 = vperm.xlu1 %1860, %v60_v23   ;;  %384 = vperm.xlu0 %1863, %v61_v24  }
  0x38   :  { %1861 = vset.pattern.permute.xlu1 %v2045_v11  ;;  %396 = vperm.xlu0 %1863, %v64_v25  }
  0x39   :  { %372 = vperm.xlu1 %1861, %v58_v14  }
  0x3d   :  { %376 = vperm.xlu1 %1861, %v59_v22  }
  0x41   :  { %1862 = vset.pattern.permute.xlu1 %v2044_v3 }
  0x42   :  { %128 = vperm.xlu1 %1862, %v61_v24  }
  0x46   :  { %138 = vperm.xlu1 %1862, %v63_v26  }
  0x4a   :  { %143 = vperm.xlu1 %1862, %v64_v25  }
  0x4e   :  { %1864 = vset.pattern.permute.xlu1 %v2045_v11 }
  0x4f   :  { %388 = vperm.xlu1 %1864, %v62_v17  }
  0x53   :  { %392 = vperm.xlu1 %1864, %v63_v26  }
  0x7f   :  { %v79_v32 = vpop.permute.xlu1 %78  ;;  %v69_v37 = vpop.permute.xlu0 %68 }
  0x80   :  { %v152_v56 = vmul.f32 %v2214_v54, %v79_v32  ;;  %v150_v58 = vmul.f32 %v2214_v54, %v69_v37 }
  0x83   :  { %v84_v33 = vpop.permute.xlu1 %83  ;;  %v74_v40 = vpop.permute.xlu0 %73 }
  0x84   :  { %v153_v1 = vmul.f32 %v2214_v54, %v84_v33  ;;  %v151_v7 = vmul.f32 %v2214_v54, %v74_v40 }
  0x87   :  { %v94_v42 = vpop.permute.xlu0 %93 }
  0x88   :  { %v341_v34 = vpop.permute.xlu1 %340  ;;  %v155_v29 = vmul.f32 %v2214_v54, %v94_v42 }
  0x89   :  { %v404_v11 = vmul.f32 %v2219_v55, %v341_v34 }
  0x8b   :  { %v2197_v44 = vpop.permute.xlu0 %113 }
  0x8c   :  { %v345_v35 = vpop.permute.xlu1 %344 }
  0x8d   :  { %v405_v59 = vmul.f32 %v2219_v55, %v345_v35 }
  0x8f   :  { %v2201_v46 = vpop.permute.xlu0 %133 }
  0x91   :  { %v89_v36 = vpop.permute.xlu1 %88 }
  0x92   :  { %v154_v18 = vmul.f32 %v2214_v54, %v89_v36 }
  0x95   :  { %v99_v38 = vpop.permute.xlu1 %98 }
  0x96   :  { %v156_v19 = vmul.f32 %v2214_v54, %v99_v38 }
  0x97   :  { %v337_v48 = vpop.permute.xlu0 %336 }
  0x98   :  { %v403_v63 = vmul.f32 %v2219_v55, %v337_v48 }
  0x99   :  { %v104_v39 = vpop.permute.xlu1 %103 }
  0x9a   :  { %v157_v22 = vmul.f32 %v2214_v54, %v104_v39 }
  0x9b   :  { %v349_v50 = vpop.permute.xlu0 %348 }
  0x9c   :  { %v406_v2 = vmul.f32 %v2219_v55, %v349_v50 }
  0x9e   :  { %v2195_v41 = vpop.permute.xlu1 %356 }
  0x9f   :  { %v353_v52 = vpop.permute.xlu0 %352  ;;  %v408_v37 = vmul.f32 %v2219_v55, %v2195_v41 }
  0xa0   :  { %v407_v23 = vmul.f32 %v2219_v55, %v353_v52 }
  0xa2   :  { %v361_v43 = vpop.permute.xlu1 %360 }
  0xa3   :  { %v365_v60 = vpop.permute.xlu0 %364  ;;  %v409_v30 = vmul.f32 %v2219_v55, %v361_v43 }
  0xa4   :  { %v410_v32 = vmul.f32 %v2219_v55, %v365_v60 }
  0xa7   :  { %v2199_v45 = vpop.permute.xlu1 %108  ;;  %v369_v12 = vpop.permute.xlu0 %368 }
  0xa8   :  { %v158_v52 = vmul.f32 %v2214_v54, %v2199_v45  ;;  %v411_v41 = vmul.f32 %v2219_v55, %v369_v12  ;;  %v159_v45 = vmul.f32 %v2214_v54, %v2197_v44 }
  0xab   :  { %v2203_v47 = vpop.permute.xlu1 %118  ;;  %v381_v33 = vpop.permute.xlu0 %380 }
  0xac   :  { %v160_v43 = vmul.f32 %v2214_v54, %v2203_v47 }
  0xaf   :  { %v2205_v49 = vpop.permute.xlu1 %123 }
  0xb4   :  { %v2207_v51 = vpop.permute.xlu1 %372 }
  0xb8   :  { %v2209_v53 = vpop.permute.xlu1 %376 }
  0xbd   :  { %v2224_v62 = vpop.permute.xlu1 %128 }
  0xc1   :  { %v2237_v16 = vpop.permute.xlu1 %138 }
  0xc5   :  { %v144_v36 = vpop.permute.xlu1 %143 }
  0xc6   :  { %v1718_v57 = vpop.f32.mrf.mxu0 }
  0xc7   :  { %v280_v61 = vadd.f32 %v1718_v57, %v152_v56 }
  0xc8   :  { %v271_v0 = vpop.f32.mrf.mxu0 }
  0xc9   :  { %v421_v3 = vadd.f32 %v405_v59, %v280_v61  ;;  %v272_v4 = vadd.f32 %v271_v0, %v150_v58  ;;  %v161_v59 = vmul.f32 %v2214_v54, %v2205_v49 }
  0xca   :  { %v1719_v6 = vpop.f32.mrf.mxu0  ;;  %v389_v58 = vpop.permute.xlu1 %388 }
  0xcb   :  { %v283_v8 = vadd.f32 %v1719_v6, %v153_v1  ;;  %v419_v9 = vadd.f32 %v403_v63, %v272_v4  ;;  %v442_v13 = vadd.f32 %v2232_v5, %v421_v3  ;;  %v385_v63 = vpop.permute.xlu0 %384  ;;  %v414_v4 = vmul.f32 %v2219_v55, %v381_v33 }
  0xcc   :  { %v274_v10 = vpop.f32.mrf.mxu0 }
  0xcd   :  { %v422_v14 = vadd.f32 %v406_v2, %v283_v8  ;;  %v275_v15 = vadd.f32 %v274_v10, %v151_v7  ;;  %v440_v24 = vadd.f32 %v2232_v5, %v419_v9  ;;  %1894 = vtanh.f32 %v442_v13 }
  0xce   :  { %v1722_v17 = vpop.f32.mrf.mxu0  ;;  %v413_v2 = vmul.f32 %v2219_v55, %v2209_v53  ;;  %v412_v7 = vmul.f32 %v2219_v55, %v2207_v51  ;;  %v393_v12 = vpop.permute.xlu1 %392 }
  0xcf   :  { %v443_v20 = vadd.f32 %v2232_v5, %v422_v14  ;;  %v420_v21 = vadd.f32 %v404_v11, %v275_v15  ;;  %v296_v27 = vadd.f32 %v1722_v17, %v156_v19  ;;  %v397_v15 = vpop.permute.xlu0 %396  ;;  %v162_v17 = vmul.f32 %v2214_v54, %v2224_v62 }
  0xd0   :  { %v287_v25 = vpop.f32.mrf.mxu0 }
  0xd1   :  { %v441_v26 = vadd.f32 %v2232_v5, %v420_v21  ;;  %v288_v28 = vadd.f32 %v287_v25, %v154_v18  ;;  %1896 = vtanh.f32 %v443_v20  ;;  %v425_v39 = vadd.f32 %v409_v30, %v296_v27 }
  0xd2   :  { %v1723_v31 = vpop.f32.mrf.mxu0  ;;  %v164_v18 = vmul.f32 %v2214_v54, %v2237_v16  ;;  %v415_v21 = vmul.f32 %v2219_v55, %v385_v63  ;;  %v163_v16 = vmul.f32 %v2214_v54, %v2201_v46 }
  0xd3   :  { %1898 = vtanh.f32 %v441_v26  ;;  %v423_v34 = vadd.f32 %v407_v23, %v288_v28  ;;  %v299_v35 = vadd.f32 %v1723_v31, %v157_v22  ;;  %v446_v0 = vadd.f32 %v2232_v5, %v425_v39 }
  0xd4   :  { %1900 = vtanh.f32 %v440_v24  ;;  %v290_v38 = vpop.f32.mrf.mxu0  ;;  %v165_v22 = vmul.f32 %v2214_v54, %v144_v36  ;;  %v417_v24 = vmul.f32 %v2219_v55, %v393_v12 }
  0xd5   :  { %v444_v40 = vadd.f32 %v2232_v5, %v423_v34  ;;  %v426_v42 = vadd.f32 %v410_v32, %v299_v35  ;;  %v291_v48 = vadd.f32 %v290_v38, %v155_v29  ;;  %v418_v29 = vmul.f32 %v2219_v55, %v397_v15 }
  0xd6   :  { %v1726_v50 = vpop.f32.mrf.mxu0  ;;  %v416_v35 = vmul.f32 %v2219_v55, %v389_v58 }
  0xd7   :  { %v447_v56 = vadd.f32 %v2232_v5, %v426_v42  ;;  %v424_v57 = vadd.f32 %v408_v37, %v291_v48  ;;  %v312_v60 = vadd.f32 %v1726_v50, %v160_v43  ;;  %1902 = vtanh.f32 %v444_v40 }
  0xd8   :  { %v303_v61 = vpop.f32.mrf.mxu0 }
  0xd9   :  { %v445_v47 = vadd.f32 %v2232_v5, %v424_v57  ;;  %v304_v1 = vadd.f32 %v303_v61, %v158_v52  ;;  %1904 = vtanh.f32 %v447_v56  ;;  %v429_v8 = vadd.f32 %v413_v2, %v312_v60 }
  0xda   :  { %v1727_v3 = vpop.f32.mrf.mxu0  ;;  %v1895_v13 = vpop.eup %1894 }
  0xdb   :  { %1906 = vtanh.f32 %v445_v47  ;;  %v427_v49 = vadd.f32 %v411_v41, %v304_v1  ;;  %v315_v6 = vadd.f32 %v1727_v3, %v161_v59  ;;  %v450_v23 = vadd.f32 %v2232_v5, %v429_v8  ;;  %v1879_v3 = vld [vmem:[%s2483_s4 + $0x30] sm:$0xff]   ;;  %v1555_v8 = vld [vmem:[%s2485_s6 + $0x1] ss:$0 sm:$0xff] }
  0xdc   :  { %v306_v9 = vpop.f32.mrf.mxu0  ;;  %1908 = vtanh.f32 %v446_v0  ;;  %1758 = vmatprep.subr.bf16.mxu0 %v1879_v3 }
  0xdd   :  { %v448_v10 = vadd.f32 %v2232_v5, %v427_v49  ;;  %v430_v11 = vadd.f32 %v414_v4, %v315_v6  ;;  %v307_v44 = vadd.f32 %v306_v9, %v159_v45  ;;  %1759 = vmatpush3.bf16.msra.mxu0 %v1879_v3  ;;  %v1880_v4 = vld [vmem:[%s2483_s4 + $0x28] sm:$0xff]   ;;  %v1881_v49 = vld [vmem:[%s2483_s4 + $0x20] sm:$0xff]   ;;  %v1882_v6 = vld [vmem:[%s2483_s4 + $0x58] sm:$0xff]  }
  0xde   :  { %v1730_v53 = vpop.f32.mrf.mxu0  ;;  %v1897_v14 = vpop.eup %1896  ;;  %1760 = vmatprep.subr.bf16.mxu0 %v1880_v4  ;;  %1780 = vmatprep.subr.bf16.mxu1 %v1882_v6  ;;  %v1886_v3 = vld [vmem:[%s2484_s5 + $0x18] sm:$0xff]  }
  0xdf   :  { %v451_v51 = vadd.f32 %v2232_v5, %v430_v11  ;;  %v428_v19 = vadd.f32 %v412_v7, %v307_v44  ;;  %1910 = vtanh.f32 %v448_v10  ;;  %v328_v27 = vadd.f32 %v1730_v53, %v164_v18 }
  0xe0   :  { %v1899_v20 = vpop.eup %1898  ;;  %v319_v25 = vpop.f32.mrf.mxu0  ;;  %v473_v34 = vpack.c.bf16 %v1897_v14, %v1895_v13 }
  0xe1   :  { %v1901_v26 = vpop.eup %1900  ;;  %v449_v62 = vadd.f32 %v2232_v5, %v428_v19  ;;  %v320_v28 = vadd.f32 %v319_v25, %v162_v17  ;;  %1912 = vtanh.f32 %v451_v51  ;;  %v433_v37 = vadd.f32 %v417_v24, %v328_v27  ;;  %1761 = vmatpush3.bf16.msra.mxu0 %v1880_v4  ;;  %v1887_v4 = vld [vmem:[%s2484_s5 + $0x38] sm:$0xff]  }
  0xe2   :  { %v1731_v30 = vpop.f32.mrf.mxu0  ;;  %v472_v31 = vpack.c.bf16 %v1899_v20, %v1901_v26  ;;  %1762 = vmatprep.subr.bf16.mxu0 %v1881_v49 }
  0xe3   :  { %1914 = vtanh.f32 %v449_v62  ;;  %v431_v32 = vadd.f32 %v415_v21, %v320_v28  ;;  %v331_v33 = vadd.f32 %v1731_v30, %v165_v22  ;;  %v454_v50 = vadd.f32 %v2232_v5, %v433_v37 }
  0xe4   :  { %1916 = vtanh.f32 %v450_v23  ;;  %1740 = vmatprep.mubr.msk.bf16.mxu1 %vm517_vm1, %v472_v31  ;;  %v322_v36 = vpop.f32.mrf.mxu0  ;;  %v1903_v54 = vpop.eup %1902 }
  0xe5   :  { %v452_v38 = vadd.f32 %v2232_v5, %v431_v32  ;;  %v434_v39 = vadd.f32 %v418_v29, %v331_v33  ;;  %v323_v46 = vadd.f32 %v322_v36, %v163_v16  ;;  %1741 = vmatmul.mubr.msk.bf16.vlgmr.msra.gmra.mxu1 %vm517_vm1, %v473_v34  ;;  %1763 = vmatpush3.bf16.msra.mxu0 %v1881_v49 }
  0xe6   :  { %v1905_v40 = vpop.eup %1904  ;;  %1781 = vmatpush3.bf16.msra.mxu1 %v1882_v6  ;;  %1804 = vmatprep.subr.bf16.mxu0 %v1886_v3  ;;  %v1576_v6 = vld [vmem:[%s2485_s6 + $0x2] ss:$0 sm:$0xff] }
  0xe7   :  { %v455_v42 = vadd.f32 %v2232_v5, %v434_v39  ;;  %v432_v48 = vadd.f32 %v416_v35, %v323_v46  ;;  %1918 = vtanh.f32 %v452_v38 }
  0xe8   :  { %v1907_v43 = vpop.eup %1906 }
  0xe9   :  { %v453_v55 = vadd.f32 %v2232_v5, %v432_v48  ;;  %v474_v52 = vpack.c.bf16 %v1907_v43, %v1903_v54  ;;  %v1909_v56 = vpop.eup %1908  ;;  %1920 = vtanh.f32 %v455_v42 }
  0xea   :  { %v475_v57 = vpack.c.bf16 %v1905_v40, %v1909_v56 }
  0xeb   :  { %1922 = vtanh.f32 %v453_v55  ;;  %1744 = vmatprep.mubr.msk.bf16.mxu1 %vm517_vm1, %v474_v52 }
  0xec   :  { %1924 = vtanh.f32 %v454_v50  ;;  %v1911_v58 = vpop.eup %1910 }
  0xed   :  { %1745 = vmatmul.mubr.msk.bf16.gmra.mxu1 %vm517_vm1, %v475_v57 }
  0xee   :  { %v1913_v41 = vpop.eup %1912 }
  0xf0   :  { %v1915_v59 = vpop.eup %1914 }
  0xf1   :  { %v1917_v60 = vpop.eup %1916  ;;  %v476_v61 = vpack.c.bf16 %v1915_v59, %v1911_v58 }
  0xf2   :  { %v477_v63 = vpack.c.bf16 %v1913_v41, %v1917_v60 }
  0xf3   :  { %1748 = vmatprep.mubr.msk.bf16.mxu1 %vm517_vm1, %v476_v61 }
  0xf4   :  { %v1919_v5 = vpop.eup %1918 }
  0xf5   :  { %1749 = vmatmul.mubr.msk.bf16.gmra.mxu1 %vm517_vm1, %v477_v63 }
  0xf6   :  { %v1921_v0 = vpop.eup %1920 }
  0xf8   :  { %v1923_v47 = vpop.eup %1922 }
  0xf9   :  { %v478_v1 = vpack.c.bf16 %v1923_v47, %v1919_v5  ;;  %v1925_v45 = vpop.eup %1924 }
  0xfa   :  { %v479_v2 = vpack.c.bf16 %v1921_v0, %v1925_v45  ;;  %v1884_v45 = vld [vmem:[%s2483_s4 + $0x48] sm:$0xff]  }
  0xfb   :  { %1752 = vmatprep.mubr.msk.bf16.mxu1 %vm517_vm1, %v478_v1  ;;  %v1883_v1 = vld [vmem:[%s2483_s4 + $0x50] sm:$0xff]  }
  0xfc   :  { %1782 = vmatprep.subr.bf16.mxu1 %v1883_v1 }
  0xfd   :  { %1753 = vmatmul.mubr.msk.bf16.gmra.mxu1 %vm517_vm1, %v479_v2  ;;  %v1885_v2 = vld [vmem:[%s2483_s4 + $0x40] sm:$0xff]  }
  0xfe   :  { %1783 = vmatpush3.bf16.msra.mxu1 %v1883_v1  ;;  %v1890_v1 = vld [vmem:[%s2484_s5 + $0x8] sm:$0xff]  }
  0xff   :  { %1784 = vmatprep.subr.bf16.mxu1 %v1884_v45 }
 0x102   :  { %1785 = vmatpush3.bf16.msra.mxu1 %v1884_v45  ;;  %v1891_v45 = vld [vmem:[%s2484_s5 + $0x28] sm:$0xff]  }
 0x103   :  { %1786 = vmatprep.subr.bf16.mxu1 %v1885_v2 }
 0x106   :  { %1787 = vmatpush3.bf16.msra.mxu1 %v1885_v2  ;;  %v1892_v2 = vld [vmem:[%s2484_s5] sm:$0xff]  }
 0x107   :  { %1828 = vmatprep.subr.bf16.mxu1 %v1887_v4 }
 0x1a5   :  { %v1742_v7 = vpop.f32.mrf.mxu1 }
 0x1a6   :  { %v585_v12 = vadd.f32 %v1742_v7, %v1555_v8 }
 0x1a7   :  { %v576_v9 = vpop.f32.mrf.mxu1 }
 0x1a8   :  { %v577_v10 = vadd.f32 %v1555_v8, %v576_v9 }
 0x1a9   :  { %v1743_v11 = vpop.f32.mrf.mxu1 }
 0x1aa   :  { %v588_v44 = vadd.f32 %v1743_v11, %v1555_v8  ;;  %1926 = vtanh.f32 %v577_v10 }
 0x1ab   :  { %v579_v13 = vpop.f32.mrf.mxu1 }
 0x1ac   :  { %v580_v53 = vadd.f32 %v1555_v8, %v579_v13  ;;  %1928 = vtanh.f32 %v588_v44 }
 0x1ad   :  { %v1746_v14 = vpop.f32.mrf.mxu1 }
 0x1ae   :  { %1930 = vtanh.f32 %v580_v53  ;;  %v601_v19 = vadd.f32 %v1746_v14, %v1555_v8 }
 0x1af   :  { %1932 = vtanh.f32 %v585_v12  ;;  %v592_v15 = vpop.f32.mrf.mxu1 }
 0x1b0   :  { %v593_v17 = vadd.f32 %v1555_v8, %v592_v15 }
 0x1b1   :  { %v1747_v18 = vpop.f32.mrf.mxu1 }
 0x1b2   :  { %v604_v51 = vadd.f32 %v1747_v18, %v1555_v8  ;;  %1934 = vtanh.f32 %v593_v17 }
 0x1b3   :  { %v595_v20 = vpop.f32.mrf.mxu1 }
 0x1b4   :  { %v596_v21 = vadd.f32 %v1555_v8, %v595_v20  ;;  %1936 = vtanh.f32 %v604_v51 }
 0x1b5   :  { %v1750_v22 = vpop.f32.mrf.mxu1 }
 0x1b6   :  { %1938 = vtanh.f32 %v596_v21  ;;  %v617_v16 = vadd.f32 %v1750_v22, %v1555_v8 }
 0x1b7   :  { %1940 = vtanh.f32 %v601_v19  ;;  %v608_v23 = vpop.f32.mrf.mxu1  ;;  %v1927_v25 = vpop.eup %1926 }
 0x1b8   :  { %v609_v24 = vadd.f32 %v1555_v8, %v608_v23 }
 0x1b9   :  { %v1751_v26 = vpop.f32.mrf.mxu1  ;;  %v1929_v62 = vpop.eup %1928 }
 0x1ba   :  { %v620_v27 = vadd.f32 %v1751_v26, %v1555_v8  ;;  %1942 = vtanh.f32 %v609_v24 }
 0x1bb   :  { %v1931_v28 = vpop.eup %1930  ;;  %v611_v29 = vpop.f32.mrf.mxu1 }
 0x1bc   :  { %v1933_v30 = vpop.eup %1932  ;;  %v612_v31 = vadd.f32 %v1555_v8, %v611_v29  ;;  %v655_v32 = vpack.c.bf16 %v1931_v28, %v1927_v25  ;;  %1944 = vtanh.f32 %v620_v27 }
 0x1bd   :  { %v656_v33 = vpack.c.bf16 %v1929_v62, %v1933_v30  ;;  %v1754_v34 = vpop.f32.mrf.mxu1 }
 0x1be   :  { %1946 = vtanh.f32 %v612_v31  ;;  %1764 = vmatprep.mubr.msk.bf16.mxu0 %vm517_vm1, %v655_v32  ;;  %v633_v40 = vadd.f32 %v1754_v34, %v1555_v8 }
 0x1bf   :  { %1948 = vtanh.f32 %v617_v16  ;;  %v624_v35 = vpop.f32.mrf.mxu1  ;;  %1765 = vmatmul.mubr.msk.bf16.vlgmr.msra.gmra.mxu0 %vm517_vm1, %v656_v33  ;;  %v1935_v37 = vpop.eup %1934 }
 0x1c0   :  { %v625_v36 = vadd.f32 %v1555_v8, %v624_v35  ;;  %1805 = vmatpush3.bf16.msra.mxu0 %v1886_v3  ;;  %v1893_v3 = vld [vmem:[%s2484_s5 + $0x20] sm:$0xff]  }
 0x1c1   :  { %v1755_v38 = vpop.f32.mrf.mxu1  ;;  %v1937_v39 = vpop.eup %1936 }
 0x1c2   :  { %v636_v46 = vadd.f32 %v1755_v38, %v1555_v8  ;;  %1950 = vtanh.f32 %v625_v36 }
 0x1c3   :  { %v1939_v54 = vpop.eup %1938  ;;  %v627_v42 = vpop.f32.mrf.mxu1 }
 0x1c4   :  { %v1941_v48 = vpop.eup %1940  ;;  %v628_v43 = vadd.f32 %v1555_v8, %v627_v42  ;;  %v657_v50 = vpack.c.bf16 %v1939_v54, %v1935_v37  ;;  %1952 = vtanh.f32 %v636_v46 }
 0x1c5   :  { %v658_v55 = vpack.c.bf16 %v1937_v39, %v1941_v48 }
 0x1c6   :  { %1954 = vtanh.f32 %v628_v43  ;;  %1768 = vmatprep.mubr.msk.bf16.mxu0 %vm517_vm1, %v657_v50 }
 0x1c7   :  { %1956 = vtanh.f32 %v633_v40  ;;  %1769 = vmatmul.mubr.msk.bf16.gmra.mxu0 %vm517_vm1, %v658_v55  ;;  %v1943_v52 = vpop.eup %1942 }
 0x1c9   :  { %v1945_v56 = vpop.eup %1944 }
 0x1cb   :  { %v1947_v57 = vpop.eup %1946 }
 0x1cc   :  { %v1949_v58 = vpop.eup %1948  ;;  %v659_v41 = vpack.c.bf16 %v1947_v57, %v1943_v52 }
 0x1cd   :  { %v660_v59 = vpack.c.bf16 %v1945_v56, %v1949_v58 }
 0x1ce   :  { %1772 = vmatprep.mubr.msk.bf16.mxu0 %vm517_vm1, %v659_v41 }
 0x1cf   :  { %1773 = vmatmul.mubr.msk.bf16.gmra.mxu0 %vm517_vm1, %v660_v59  ;;  %v1951_v60 = vpop.eup %1950 }
 0x1d1   :  { %v1953_v61 = vpop.eup %1952 }
 0x1d3   :  { %v1955_v63 = vpop.eup %1954 }
 0x1d4   :  { %v1957_v5 = vpop.eup %1956  ;;  %v661_v0 = vpack.c.bf16 %v1955_v63, %v1951_v60 }
 0x1d5   :  { %v662_v47 = vpack.c.bf16 %v1953_v61, %v1957_v5 }
 0x1d6   :  { %1776 = vmatprep.mubr.msk.bf16.mxu0 %vm517_vm1, %v661_v0  ;;  %v1888_v0 = vld [vmem:[%s2484_s5 + $0x10] sm:$0xff]  }
 0x1d7   :  { %1777 = vmatmul.mubr.msk.bf16.gmra.mxu0 %vm517_vm1, %v662_v47  ;;  %v1889_v47 = vld [vmem:[%s2484_s5 + $0x30] sm:$0xff]   ;;  %1806 = vmatprep.subr.bf16.mxu0 %v1888_v0 }
 0x1d8   :  { %1807 = vmatpush3.bf16.msra.mxu0 %v1888_v0  ;;  %v2390_v0 = vld [vmem:[%s2486_s7 + $0x1] ss:$0 sm:$0xff] }
 0x1d9   :  { %1808 = vmatprep.subr.bf16.mxu0 %v1890_v1 }
 0x1dc   :  { %1809 = vmatpush3.bf16.msra.mxu0 %v1890_v1 }
 0x1dd   :  { %1810 = vmatprep.subr.bf16.mxu0 %v1892_v2 }
 0x1e0   :  { %1811 = vmatpush3.bf16.msra.mxu0 %v1892_v2 }
 0x27f   :  { %v1766_v49 = vpop.f32.mrf.mxu0 }
 0x280   :  { %v768_v11 = vadd.f32 %v1766_v49, %v1576_v6  ;;  %v1597_v49 = vld [vmem:[%s2485_s6 + $0x3] ss:$0 sm:$0xff] }
 0x281   :  { %v759_v7 = vpop.f32.mrf.mxu0 }
 0x282   :  { %v760_v8 = vadd.f32 %v1576_v6, %v759_v7 }
 0x283   :  { %v1767_v9 = vpop.f32.mrf.mxu0 }
 0x284   :  { %v771_v10 = vadd.f32 %v1767_v9, %v1576_v6  ;;  %1958 = vtanh.f32 %v760_v8 }
 0x285   :  { %v762_v44 = vpop.f32.mrf.mxu0 }
 0x286   :  { %v763_v12 = vadd.f32 %v1576_v6, %v762_v44  ;;  %1960 = vtanh.f32 %v771_v10 }
 0x287   :  { %v1770_v13 = vpop.f32.mrf.mxu0 }
 0x288   :  { %1962 = vtanh.f32 %v763_v12  ;;  %v784_v18 = vadd.f32 %v1770_v13, %v1576_v6 }
 0x289   :  { %1964 = vtanh.f32 %v768_v11  ;;  %v775_v53 = vpop.f32.mrf.mxu0 }
 0x28a   :  { %v776_v14 = vadd.f32 %v1576_v6, %v775_v53 }
 0x28b   :  { %v1771_v15 = vpop.f32.mrf.mxu0 }
 0x28c   :  { %v787_v17 = vadd.f32 %v1771_v15, %v1576_v6  ;;  %1966 = vtanh.f32 %v776_v14 }
 0x28d   :  { %v778_v51 = vpop.f32.mrf.mxu0 }
 0x28e   :  { %v779_v19 = vadd.f32 %v1576_v6, %v778_v51  ;;  %1968 = vtanh.f32 %v787_v17 }
 0x28f   :  { %v1774_v20 = vpop.f32.mrf.mxu0 }
 0x290   :  { %1970 = vtanh.f32 %v779_v19  ;;  %v800_v27 = vadd.f32 %v1774_v20, %v1576_v6 }
 0x291   :  { %1972 = vtanh.f32 %v784_v18  ;;  %v791_v21 = vpop.f32.mrf.mxu0  ;;  %v1959_v23 = vpop.eup %1958 }
 0x292   :  { %v792_v22 = vadd.f32 %v1576_v6, %v791_v21 }
 0x293   :  { %v1775_v24 = vpop.f32.mrf.mxu0  ;;  %v1961_v25 = vpop.eup %1960 }
 0x294   :  { %v803_v26 = vadd.f32 %v1775_v24, %v1576_v6  ;;  %1974 = vtanh.f32 %v792_v22 }
 0x295   :  { %v1963_v62 = vpop.eup %1962  ;;  %v794_v28 = vpop.f32.mrf.mxu0 }
 0x296   :  { %v1965_v16 = vpop.eup %1964  ;;  %v795_v29 = vadd.f32 %v1576_v6, %v794_v28  ;;  %v838_v30 = vpack.c.bf16 %v1963_v62, %v1959_v23  ;;  %1976 = vtanh.f32 %v803_v26 }
 0x297   :  { %v839_v31 = vpack.c.bf16 %v1961_v25, %v1965_v16  ;;  %v1778_v32 = vpop.f32.mrf.mxu0 }
 0x298   :  { %1978 = vtanh.f32 %v795_v29  ;;  %1788 = vmatprep.mubr.msk.bf16.mxu1 %vm517_vm1, %v838_v30  ;;  %v816_v46 = vadd.f32 %v1778_v32, %v1576_v6 }
 0x299   :  { %1980 = vtanh.f32 %v800_v27  ;;  %v807_v33 = vpop.f32.mrf.mxu0  ;;  %1789 = vmatmul.mubr.msk.bf16.vlgmr.msra.gmra.mxu1 %vm517_vm1, %v839_v31  ;;  %v1967_v35 = vpop.eup %1966 }
 0x29a   :  { %v808_v34 = vadd.f32 %v1576_v6, %v807_v33  ;;  %1829 = vmatpush3.bf16.msra.mxu1 %v1887_v4 }
 0x29b   :  { %v1779_v36 = vpop.f32.mrf.mxu0  ;;  %v1969_v37 = vpop.eup %1968  ;;  %1830 = vmatprep.subr.bf16.mxu1 %v1889_v47 }
 0x29c   :  { %v819_v38 = vadd.f32 %v1779_v36, %v1576_v6  ;;  %1982 = vtanh.f32 %v808_v34 }
 0x29d   :  { %v1971_v39 = vpop.eup %1970  ;;  %v810_v54 = vpop.f32.mrf.mxu0 }
 0x29e   :  { %v1973_v40 = vpop.eup %1972  ;;  %v811_v42 = vadd.f32 %v1576_v6, %v810_v54  ;;  %v840_v48 = vpack.c.bf16 %v1971_v39, %v1967_v35  ;;  %1984 = vtanh.f32 %v819_v38  ;;  %1831 = vmatpush3.bf16.msra.mxu1 %v1889_v47 }
 0x29f   :  { %v841_v43 = vpack.c.bf16 %v1969_v37, %v1973_v40  ;;  %1832 = vmatprep.subr.bf16.mxu1 %v1891_v45 }
 0x2a0   :  { %1986 = vtanh.f32 %v811_v42  ;;  %1792 = vmatprep.mubr.msk.bf16.mxu1 %vm517_vm1, %v840_v48 }
 0x2a1   :  { %1988 = vtanh.f32 %v816_v46  ;;  %1793 = vmatmul.mubr.msk.bf16.gmra.mxu1 %vm517_vm1, %v841_v43  ;;  %v1975_v50 = vpop.eup %1974 }
 0x2a2   :  { %1833 = vmatpush3.bf16.msra.mxu1 %v1891_v45 }
 0x2a3   :  { %v1977_v55 = vpop.eup %1976  ;;  %1834 = vmatprep.subr.bf16.mxu1 %v1893_v3 }
 0x2a5   :  { %v1979_v52 = vpop.eup %1978 }
 0x2a6   :  { %v1981_v56 = vpop.eup %1980  ;;  %v842_v57 = vpack.c.bf16 %v1979_v52, %v1975_v50  ;;  %1835 = vmatpush3.bf16.msra.mxu1 %v1893_v3 }
 0x2a7   :  { %v843_v58 = vpack.c.bf16 %v1977_v55, %v1981_v56 }
 0x2a8   :  { %1796 = vmatprep.mubr.msk.bf16.mxu1 %vm517_vm1, %v842_v57 }
 0x2a9   :  { %1797 = vmatmul.mubr.msk.bf16.gmra.mxu1 %vm517_vm1, %v843_v58  ;;  %v1983_v41 = vpop.eup %1982 }
 0x2ab   :  { %v1985_v59 = vpop.eup %1984 }
 0x2ad   :  { %v1987_v60 = vpop.eup %1986 }
 0x2ae   :  { %v1989_v61 = vpop.eup %1988  ;;  %v844_v63 = vpack.c.bf16 %v1987_v60, %v1983_v41 }
 0x2af   :  { %v845_v5 = vpack.c.bf16 %v1985_v59, %v1989_v61 }
 0x2b0   :  { %1800 = vmatprep.mubr.msk.bf16.mxu1 %vm517_vm1, %v844_v63 }
 0x2b1   :  { %1801 = vmatmul.mubr.msk.bf16.gmra.mxu1 %vm517_vm1, %v845_v5  ;;  %v2385_v5 = vld [vmem:[%s2486_s7] ss:$0 sm:$0xff]  ;;  %s2046_s7 = smov [#allocation2]  }
 0x2b2   :  { %s1527_s9 = sshll.u32 %s2046_s7, 4  ;;  %s1528_s9 = int_to_ptr.vmem [resolvable:$true] %s1527_s9 }
 0x2b3   :  { %s2022_s10 = scalar_lea.vmem %s1528_s9, 16  ;;  %s2026_s11 = scalar_lea.vmem %s1528_s9, 32 }
 0x2b4   :  { %p2023_p0 = scmp.ne.s32.totalorder %s1528_s9, %s2022_s10  ;;  %p2027_p1 = scmp.lt.s32.totalorder %s1528_s9, %s1528_s9 }
 0x2b5   :  { %p2028_p2 = scmp.lt.s32.totalorder %s2026_s11, %s2022_s10 }
 0x2b7   :  { %p2029_p3 = por %p2028_p2, %p2027_p1 }
 0x2b9   :  { %p2030_p4 = pnand %p2029_p3, %p2023_p0 }
 0x359   :  { %v1790_v4 = vpop.f32.mrf.mxu1 }
 0x35a   :  { %v951_v10 = vadd.f32 %v1790_v4, %v1597_v49 }
 0x35b   :  { %v942_v6 = vpop.f32.mrf.mxu1 }
 0x35c   :  { %v943_v7 = vadd.f32 %v1597_v49, %v942_v6 }
 0x35d   :  { %v1791_v8 = vpop.f32.mrf.mxu1 }
 0x35e   :  { %v954_v9 = vadd.f32 %v1791_v8, %v1597_v49  ;;  %1990 = vtanh.f32 %v943_v7 }
 0x35f   :  { %v945_v11 = vpop.f32.mrf.mxu1 }
 0x360   :  { %v946_v44 = vadd.f32 %v1597_v49, %v945_v11  ;;  %1992 = vtanh.f32 %v954_v9 }
 0x361   :  { %v1794_v12 = vpop.f32.mrf.mxu1 }
 0x362   :  { %1994 = vtanh.f32 %v946_v44  ;;  %v967_v17 = vadd.f32 %v1794_v12, %v1597_v49 }
 0x363   :  { %1996 = vtanh.f32 %v951_v10  ;;  %v958_v13 = vpop.f32.mrf.mxu1 }
 0x364   :  { %v959_v53 = vadd.f32 %v1597_v49, %v958_v13 }
 0x365   :  { %v1795_v14 = vpop.f32.mrf.mxu1 }
 0x366   :  { %v970_v15 = vadd.f32 %v1795_v14, %v1597_v49  ;;  %1998 = vtanh.f32 %v959_v53 }
 0x367   :  { %v961_v18 = vpop.f32.mrf.mxu1 }
 0x368   :  { %v962_v51 = vadd.f32 %v1597_v49, %v961_v18  ;;  %2000 = vtanh.f32 %v970_v15 }
 0x369   :  { %v1798_v19 = vpop.f32.mrf.mxu1 }
 0x36a   :  { %2002 = vtanh.f32 %v962_v51  ;;  %v983_v62 = vadd.f32 %v1798_v19, %v1597_v49 }
 0x36b   :  { %2004 = vtanh.f32 %v967_v17  ;;  %v974_v20 = vpop.f32.mrf.mxu1  ;;  %v1991_v22 = vpop.eup %1990 }
 0x36c   :  { %v975_v21 = vadd.f32 %v1597_v49, %v974_v20 }
 0x36d   :  { %v1799_v23 = vpop.f32.mrf.mxu1  ;;  %v1993_v24 = vpop.eup %1992 }
 0x36e   :  { %v986_v25 = vadd.f32 %v1799_v23, %v1597_v49  ;;  %2006 = vtanh.f32 %v975_v21 }
 0x36f   :  { %v1995_v26 = vpop.eup %1994  ;;  %v977_v27 = vpop.f32.mrf.mxu1 }
 0x370   :  { %v1997_v28 = vpop.eup %1996  ;;  %v978_v16 = vadd.f32 %v1597_v49, %v977_v27  ;;  %v1021_v29 = vpack.c.bf16 %v1995_v26, %v1991_v22  ;;  %2008 = vtanh.f32 %v986_v25 }
 0x371   :  { %v1022_v30 = vpack.c.bf16 %v1993_v24, %v1997_v28  ;;  %v1802_v31 = vpop.f32.mrf.mxu1 }
 0x372   :  { %2010 = vtanh.f32 %v978_v16  ;;  %1812 = vmatprep.mubr.msk.bf16.mxu0 %vm517_vm1, %v1021_v29  ;;  %1836 = vmatprep.mubr.msk.bf16.mxu1 %vm517_vm1, %v1021_v29  ;;  %v999_v39 = vadd.f32 %v1802_v31, %v1597_v49 }
 0x373   :  { %2012 = vtanh.f32 %v983_v62  ;;  %v990_v32 = vpop.f32.mrf.mxu1  ;;  %1813 = vmatmul.mubr.msk.bf16.vlgmr.msra.gmra.mxu0 %vm517_vm1, %v1022_v30  ;;  %1837 = vmatmul.mubr.msk.bf16.vlgmr.msra.gmra.mxu1 %vm517_vm1, %v1022_v30  ;;  %v1999_v34 = vpop.eup %1998 }
 0x374   :  { %v991_v33 = vadd.f32 %v1597_v49, %v990_v32 }
 0x375   :  { %v1803_v35 = vpop.f32.mrf.mxu1  ;;  %v2001_v36 = vpop.eup %2000 }
 0x376   :  { %v1002_v37 = vadd.f32 %v1803_v35, %v1597_v49  ;;  %2014 = vtanh.f32 %v991_v33 }
 0x377   :  { %v2003_v38 = vpop.eup %2002  ;;  %v993_v46 = vpop.f32.mrf.mxu1 }
 0x378   :  { %v2005_v54 = vpop.eup %2004  ;;  %v994_v40 = vadd.f32 %v1597_v49, %v993_v46  ;;  %v1023_v42 = vpack.c.bf16 %v2003_v38, %v1999_v34  ;;  %2016 = vtanh.f32 %v1002_v37 }
 0x379   :  { %v1024_v48 = vpack.c.bf16 %v2001_v36, %v2005_v54 }
 0x37a   :  { %2018 = vtanh.f32 %v994_v40  ;;  %1816 = vmatprep.mubr.msk.bf16.mxu0 %vm517_vm1, %v1023_v42  ;;  %1840 = vmatprep.mubr.msk.bf16.mxu1 %vm517_vm1, %v1023_v42 }
 0x37b   :  { %2020 = vtanh.f32 %v999_v39  ;;  %1817 = vmatmul.mubr.msk.bf16.gmra.mxu0 %vm517_vm1, %v1024_v48  ;;  %1841 = vmatmul.mubr.msk.bf16.gmra.mxu1 %vm517_vm1, %v1024_v48  ;;  %v2007_v43 = vpop.eup %2006 }
 0x37d   :  { %v2009_v50 = vpop.eup %2008 }
 0x37f   :  { %v2011_v55 = vpop.eup %2010 }
 0x380   :  { %v2013_v52 = vpop.eup %2012  ;;  %v1025_v56 = vpack.c.bf16 %v2011_v55, %v2007_v43 }
 0x381   :  { %v1026_v57 = vpack.c.bf16 %v2009_v50, %v2013_v52 }
 0x382   :  { %1820 = vmatprep.mubr.msk.bf16.mxu0 %vm517_vm1, %v1025_v56  ;;  %1844 = vmatprep.mubr.msk.bf16.mxu1 %vm517_vm1, %v1025_v56 }
 0x383   :  { %1821 = vmatmul.mubr.msk.bf16.gmra.mxu0 %vm517_vm1, %v1026_v57  ;;  %1845 = vmatmul.mubr.msk.bf16.gmra.mxu1 %vm517_vm1, %v1026_v57  ;;  %v2015_v58 = vpop.eup %2014 }
 0x385   :  { %v2017_v41 = vpop.eup %2016 }
 0x387   :  { %v2019_v59 = vpop.eup %2018 }
 0x388   :  { %v2021_v60 = vpop.eup %2020  ;;  %v1027_v61 = vpack.c.bf16 %v2019_v59, %v2015_v58 }
 0x389   :  { %v1028_v63 = vpack.c.bf16 %v2017_v41, %v2021_v60 }
 0x38a   :  { %1824 = vmatprep.mubr.msk.bf16.mxu0 %vm517_vm1, %v1027_v61  ;;  %1848 = vmatprep.mubr.msk.bf16.mxu1 %vm517_vm1, %v1027_v61 }
 0x38b   :  { %1825 = vmatmul.mubr.msk.bf16.gmra.mxu0 %vm517_vm1, %v1028_v63  ;;  %1849 = vmatmul.mubr.msk.bf16.gmra.mxu1 %vm517_vm1, %v1028_v63  ;;  %vm1517_vm1 = vcmask 1048512  }
 0x433   :  { %v1814_v47 = vpop.f32.mrf.mxu0  ;;  %v1838_v1 = vpop.f32.mrf.mxu1 }
 0x434   :  { %v1135_v45 = vadd.f32 %v1814_v47, %v2385_v5  ;;  %v1273_v2 = vadd.f32 %v1838_v1, %v2390_v0 }
 0x435   :  { %v1126_v3 = vpop.f32.mrf.mxu0  ;;  %v1264_v4 = vpop.f32.mrf.mxu1 }
 0x436   :  { %v1127_v49 = vadd.f32 %v2385_v5, %v1126_v3  ;;  %v1265_v6 = vadd.f32 %v2390_v0, %v1264_v4  ;;  %v1329_v7 = vmul.f32 %v1273_v2, %v1135_v45 }
 0x437   :  { %v1815_v8 = vpop.f32.mrf.mxu0  ;;  %v1839_v9 = vpop.f32.mrf.mxu1 }
 0x438   :  { %v1138_v10 = vadd.f32 %v1815_v8, %v2385_v5  ;;  %v1276_v11 = vadd.f32 %v1839_v9, %v2390_v0  ;;  %v1350_v44 = vsel %vm1343_vm2, %v1329_v7, 0.0  ;;  %v1327_v12 = vmul.f32 %v1265_v6, %v1127_v49 }
 0x439   :  { %v1267_v13 = vpop.f32.mrf.mxu1  ;;  %1351 = vadd.xlane.f32.xlu0 %v1350_v44  ;;  %v1129_v53 = vpop.f32.mrf.mxu0 }
 0x43a   :  { %v1268_v14 = vadd.f32 %v2390_v0, %v1267_v13  ;;  %v1130_v15 = vadd.f32 %v2385_v5, %v1129_v53  ;;  %v1344_v17 = vsel %vm1343_vm2, %v1327_v12, 0.0  ;;  %v1330_v18 = vmul.f32 %v1276_v11, %v1138_v10 }
 0x43b   :  { %v1818_v51 = vpop.f32.mrf.mxu0  ;;  %v1842_v19 = vpop.f32.mrf.mxu1  ;;  %1345 = vadd.xlane.f32.xlu1 %v1344_v17 }
 0x43c   :  { %v1151_v20 = vadd.f32 %v1818_v51, %v2385_v5  ;;  %v1289_v21 = vadd.f32 %v1842_v19, %v2390_v0  ;;  %v1328_v22 = vmul.f32 %v1268_v14, %v1130_v15  ;;  %v1353_v25 = vsel %vm1343_vm2, %v1330_v18, 0.0 }
 0x43d   :  { %v1142_v23 = vpop.f32.mrf.mxu0  ;;  %v1280_v24 = vpop.f32.mrf.mxu1 }
 0x43e   :  { %v1143_v26 = vadd.f32 %v2385_v5, %v1142_v23  ;;  %v1281_v62 = vadd.f32 %v2390_v0, %v1280_v24  ;;  %v1347_v27 = vsel %vm1343_vm2, %v1328_v22, 0.0  ;;  %v1333_v28 = vmul.f32 %v1289_v21, %v1151_v20 }
 0x43f   :  { %v1819_v16 = vpop.f32.mrf.mxu0  ;;  %v1843_v29 = vpop.f32.mrf.mxu1  ;;  %1348 = vadd.xlane.f32.xlu0 %v1347_v27  ;;  %1354 = vadd.xlane.f32.xlu1 %v1353_v25 }
 0x440   :  { %v1154_v30 = vadd.f32 %v1819_v16, %v2385_v5  ;;  %v1292_v31 = vadd.f32 %v1843_v29, %v2390_v0  ;;  %v1362_v34 = vsel %vm1343_vm2, %v1333_v28, 0.0  ;;  %v1331_v38 = vmul.f32 %v1281_v62, %v1143_v26 }
 0x441   :  { %v1145_v32 = vpop.f32.mrf.mxu0  ;;  %v1283_v33 = vpop.f32.mrf.mxu1  ;;  %v1408_v29 = vlaneseq }
 0x442   :  { %v1146_v35 = vadd.f32 %v2385_v5, %v1145_v32  ;;  %v1284_v36 = vadd.f32 %v2390_v0, %v1283_v33  ;;  %v1334_v37 = vmul.f32 %v1292_v31, %v1154_v30  ;;  %v1356_v56 = vsel %vm1343_vm2, %v1331_v38, 0.0 }
 0x443   :  { %v1822_v39 = vpop.f32.mrf.mxu0  ;;  %v1846_v46 = vpop.f32.mrf.mxu1  ;;  %1363 = vadd.xlane.f32.xlu0 %v1362_v34  ;;  %v2440_v30 = vand.u32 127, %v1408_v29 }
 0x444   :  { %v1167_v54 = vadd.f32 %v1822_v39, %v2385_v5  ;;  %v1305_v40 = vadd.f32 %v1846_v46, %v2390_v0  ;;  %v1365_v42 = vsel %vm1343_vm2, %v1334_v37, 0.0  ;;  %v1332_v48 = vmul.f32 %v1284_v36, %v1146_v35 }
 0x445   :  { %v1158_v43 = vpop.f32.mrf.mxu0  ;;  %v1296_v50 = vpop.f32.mrf.mxu1  ;;  %1366 = vadd.xlane.f32.xlu1 %v1365_v42  ;;  %v1421_v33 = vadd.s32 4294967280, %v2440_v30  ;;  %v1428_v37 = vadd.s32 4294967272, %v2440_v30  ;;  %v1435_v46 = vadd.s32 4294967264, %v2440_v30  ;;  %v1442_v42 = vadd.s32 4294967256, %v2440_v30 }
 0x446   :  { %v1159_v55 = vadd.f32 %v2385_v5, %v1158_v43  ;;  %v1297_v52 = vadd.f32 %v2390_v0, %v1296_v50  ;;  %v1337_v57 = vmul.f32 %v1305_v40, %v1167_v54  ;;  %v1359_v61 = vsel %vm1343_vm2, %v1332_v48, 0.0 }
 0x447   :  { %v1823_v58 = vpop.f32.mrf.mxu0  ;;  %v1847_v41 = vpop.f32.mrf.mxu1  ;;  %1357 = vadd.xlane.f32.xlu0 %v1356_v56 }
 0x448   :  { %v1170_v59 = vadd.f32 %v1823_v58, %v2385_v5  ;;  %v1308_v60 = vadd.f32 %v1847_v41, %v2390_v0  ;;  %v1374_v1 = vsel %vm1343_vm2, %v1337_v57, 0.0  ;;  %v1335_v4 = vmul.f32 %v1297_v52, %v1159_v55 }
 0x449   :  { %v1161_v63 = vpop.f32.mrf.mxu0  ;;  %v1299_v47 = vpop.f32.mrf.mxu1  ;;  %1360 = vadd.xlane.f32.xlu1 %v1359_v61  ;;  %v1449_v52 = vadd.s32 4294967248, %v2440_v30 }
 0x44a   :  { %v1162_v45 = vadd.f32 %v2385_v5, %v1161_v63  ;;  %v1300_v2 = vadd.f32 %v2390_v0, %v1299_v47  ;;  %v1338_v3 = vmul.f32 %v1308_v60, %v1170_v59  ;;  %v1368_v53 = vsel %vm1343_vm2, %v1335_v4, 0.0 }
 0x44b   :  { %v1826_v49 = vpop.f32.mrf.mxu0  ;;  %v1850_v6 = vpop.f32.mrf.mxu1  ;;  %1375 = vadd.xlane.f32.xlu0 %v1374_v1  ;;  %v1456_v60 = vadd.s32 4294967240, %v2440_v30  ;;  %v1463_v1 = vadd.s32 4294967232, %v2440_v30 }
 0x44c   :  { %v1377_v7 = vsel %vm1343_vm2, %v1338_v3, 0.0  ;;  %v1336_v8 = vmul.f32 %v1300_v2, %v1162_v45  ;;  %v1183_v9 = vadd.f32 %v1826_v49, %v2385_v5  ;;  %v1321_v10 = vadd.f32 %v1850_v6, %v2390_v0 }
 0x44d   :  { %v1174_v11 = vpop.f32.mrf.mxu0  ;;  %v1312_v44 = vpop.f32.mrf.mxu1  ;;  %1378 = vadd.xlane.f32.xlu1 %v1377_v7  ;;  %v1470_v49 = vadd.s32 4294967224, %v2440_v30  ;;  %v1477_v7 = vadd.s32 4294967216, %v2440_v30 }
 0x44e   :  { %v1175_v12 = vadd.f32 %v2385_v5, %v1174_v11  ;;  %v1313_v13 = vadd.f32 %v2390_v0, %v1312_v44  ;;  %v1371_v17 = vsel %vm1343_vm2, %v1336_v8, 0.0  ;;  %v1341_v21 = vmul.f32 %v1321_v10, %v1183_v9 }
 0x44f   :  { %v1827_v14 = vpop.f32.mrf.mxu0  ;;  %v1851_v15 = vpop.f32.mrf.mxu1  ;;  %1369 = vadd.xlane.f32.xlu0 %v1368_v53  ;;  %v1484_v11 = vadd.s32 4294967208, %v2440_v30 }
 0x450   :  { %v1339_v18 = vmul.f32 %v1313_v13, %v1175_v12  ;;  %v1186_v51 = vadd.f32 %v1827_v14, %v2385_v5  ;;  %v1324_v22 = vadd.f32 %v1851_v15, %v2390_v0  ;;  %v1386_v62 = vsel %vm1343_vm2, %v1341_v21, 0.0 }
 0x451   :  { %v1177_v19 = vpop.f32.mrf.mxu0  ;;  %v1315_v20 = vpop.f32.mrf.mxu1  ;;  %1372 = vadd.xlane.f32.xlu1 %v1371_v17  ;;  %v1491_v13 = vadd.s32 4294967200, %v2440_v30 }
 0x452   :  { %v1178_v23 = vadd.f32 %v2385_v5, %v1177_v19  ;;  %v1316_v24 = vadd.f32 %v2390_v0, %v1315_v20  ;;  %v1380_v25 = vsel %vm1343_vm2, %v1339_v18, 0.0  ;;  %v1342_v28 = vmul.f32 %v1324_v22, %v1186_v51 }
 0x453   :  { %1381 = vadd.xlane.f32.xlu0 %v1380_v25  ;;  %v1414_v5 = vadd.s32 4294967288, %v2440_v30  ;;  %v2443_v0 = vshrl.u32 %v1408_v29, 7  ;;  %v1498_v20 = vadd.s32 4294967192, %v2440_v30 }
 0x454   :  { %v1340_v26 = vmul.f32 %v1316_v24, %v1178_v23  ;;  %v1389_v16 = vsel %vm1343_vm2, %v1342_v28, 0.0  ;;  %v1505_v24 = vadd.s32 4294967184, %v2440_v30 }
 0x455   :  { %v1417_v34 = vsub.s32 %v1414_v5, %v2443_v0  ;;  %v1412_v35 = vsub.s32 %v2440_v30, %v2443_v0  ;;  %v1424_v38 = vsub.s32 %v1421_v33, %v2443_v0  ;;  %v1431_v43 = vsub.s32 %v1428_v37, %v2443_v0 }
 0x456   :  { %v1383_v27 = vsel %vm1343_vm2, %v1340_v26, 0.0  ;;  %v1438_v56 = vsub.s32 %v1435_v46, %v2443_v0  ;;  %v1445_v41 = vsub.s32 %v1442_v42, %v2443_v0  ;;  %v1452_v63 = vsub.s32 %v1449_v52, %v2443_v0 }
 0x457   :  { %1387 = vadd.xlane.f32.xlu0 %v1386_v62  ;;  %1384 = vadd.xlane.f32.xlu1 %v1383_v27  ;;  %v1459_v6 = vsub.s32 %v1456_v60, %v2443_v0  ;;  %v1466_v44 = vsub.s32 %v1463_v1, %v2443_v0  ;;  %v1473_v14 = vsub.s32 %v1470_v49, %v2443_v0  ;;  %v1512_v5 = vadd.s32 4294967176, %v2440_v30 }
 0x458   :  { %v1480_v17 = vsub.s32 %v1477_v7, %v2443_v0  ;;  %v1487_v51 = vsub.s32 %v1484_v11, %v2443_v0  ;;  %v1494_v23 = vsub.s32 %v1491_v13, %v2443_v0  ;;  %v1501_v29 = vsub.s32 %v1498_v20, %v2443_v0 }
 0x459   :  { %v1508_v33 = vsub.s32 %v1505_v24, %v2443_v0 }
 0x45b   :  { %1390 = vadd.xlane.f32.xlu1 %v1389_v16 }
 0x4c2   :  { %v1352_v31 = vpop.xlane.xlu0 %1351 }
 0x4c3   :  { %v1425_v55 = vrot.slane %v1352_v31, %v1424_v38  ;;  %v1515_v38 = vsub.s32 %v1512_v5, %v2443_v0 }
 0x4c4   :  { %v1346_v32 = vpop.xlane.xlu1 %1345 }
 0x4c5   :  { %v1413_v54 = vrot.slane %v1346_v32, %v1412_v35 }
 0x4c8   :  { %v1349_v36 = vpop.xlane.xlu0 %1348  ;;  %v1355_v40 = vpop.xlane.xlu1 %1354 }
 0x4c9   :  { %v1418_v39 = vrot.slane %v1349_v36, %v1417_v34  ;;  %v1432_v59 = vrot.slane %v1355_v40, %v1431_v43 }
 0x4cb   :  { %v1420_v48 = vsel %vm1419_vm3, %v1418_v39, %v1413_v54 }
 0x4cc   :  { %v1364_v50 = vpop.xlane.xlu0 %1363  ;;  %v1427_v58 = vsel %vm1426_vm4, %v1425_v55, %v1420_v48 }
 0x4cd   :  { %v1434_v45 = vsel %vm1433_vm5, %v1432_v59, %v1427_v58  ;;  %v1453_v9 = vrot.slane %v1364_v50, %v1452_v63 }
 0x4ce   :  { %v1367_v57 = vpop.xlane.xlu1 %1366 }
 0x4cf   :  { %v1460_v15 = vrot.slane %v1367_v57, %v1459_v6 }
 0x4d0   :  { %v1358_v61 = vpop.xlane.xlu0 %1357 }
 0x4d1   :  { %v1439_v47 = vrot.slane %v1358_v61, %v1438_v56 }
 0x4d2   :  { %v1361_v2 = vpop.xlane.xlu1 %1360 }
 0x4d3   :  { %v1441_v3 = vsel %vm1440_vm6, %v1439_v47, %v1434_v45  ;;  %v1446_v4 = vrot.slane %v1361_v2, %v1445_v41 }
 0x4d4   :  { %v1376_v8 = vpop.xlane.xlu0 %1375 }
 0x4d5   :  { %v1448_v10 = vsel %vm1447_vm7, %v1446_v4, %v1441_v3  ;;  %v1481_v62 = vrot.slane %v1376_v8, %v1480_v17 }
 0x4d6   :  { %v1379_v12 = vpop.xlane.xlu1 %1378  ;;  %v1455_v53 = vsel %vm1454_vm8, %v1453_v9, %v1448_v10 }
 0x4d7   :  { %v1462_v21 = vsel %vm1461_vm9, %v1460_v15, %v1455_v53  ;;  %v1488_v28 = vrot.slane %v1379_v12, %v1487_v51 }
 0x4d8   :  { %v1370_v18 = vpop.xlane.xlu0 %1369 }
 0x4d9   :  { %v1467_v19 = vrot.slane %v1370_v18, %v1466_v44 }
 0x4da   :  { %v1373_v22 = vpop.xlane.xlu1 %1372 }
 0x4db   :  { %v1469_v25 = vsel %vm1468_vm10, %v1467_v19, %v1462_v21  ;;  %v1474_v26 = vrot.slane %v1373_v22, %v1473_v14 }
 0x4dc   :  { %v1382_v27 = vpop.xlane.xlu0 %1381 }
 0x4dd   :  { %v1476_v16 = vsel %vm1475_vm11, %v1474_v26, %v1469_v25  ;;  %v1495_v32 = vrot.slane %v1382_v27, %v1494_v23 }
 0x4de   :  { %v1483_v31 = vsel %vm1482_vm12, %v1481_v62, %v1476_v16 }
 0x4df   :  { %v1490_v34 = vsel %vm1489_vm13, %v1488_v28, %v1483_v31 }
 0x4e0   :  { %v1388_v35 = vpop.xlane.xlu0 %1387  ;;  %v1385_v36 = vpop.xlane.xlu1 %1384  ;;  %v1497_v39 = vsel %vm1496_vm14, %v1495_v32, %v1490_v34 }
 0x4e1   :  { %v1502_v37 = vrot.slane %v1385_v36, %v1501_v29  ;;  %v1509_v46 = vrot.slane %v1388_v35, %v1508_v33 }
 0x4e3   :  { %v1504_v54 = vsel %vm1503_vm15, %v1502_v37, %v1497_v39 }
 0x4e4   :  { %v1391_v40 = vpop.xlane.xlu1 %1390  ;;  %v1511_v42 = vsel %vm1510_vm0, %v1509_v46, %v1504_v54 }
 0x4e5   :  { %v1516_v30 = vrot.slane %v1391_v40, %v1515_v38 }
 0x4e7   :  { %v1518_v48 = vsel %vm1517_vm1, %v1516_v30, %v1511_v42 }
 0x4e8   :  { %1520 = vst [vmem:[#allocation2] sm:$0x1] %v1518_v48 }
 0x4e9   :  { %2033 = shalt.err (!%p2030_p4)
}
 0x4ea   :  { %1530 = dma.vmem_to_hbm [thread:$0]  %s1528_s9, 16, %s2487_s8, [#allocation3]  }
 0x4eb   :  { %2042 = dma.done.wait [#allocation3], 16  }
 0x4ec   :  { %2043 = vsyncadd [#allocation3], 4294967280 }
 0x4ed   :  { %1534 = vsyncpa [#allocation3], 1 }

</bundles_post_ra>
